<compile_context>
chip_gen: v7x
topology: tpu7x:2x2x1
jax: 0.10.0
libtpu: 0.0.40
codegen_flags: <defaults>
</compile_context>

<pallas_src>
import jax
import jax.numpy as jnp
import numpy as np
from jax.experimental import pallas as pl
from jax.experimental.pallas import tpu as pltpu

LANE = 128
TILE_N_MAX = 512   # node rows per grid step; tiny vs. 32 MiB scoped VMEM at H=32


def _round_up(x, m):
    return ((x + m - 1) // m) * m


def pooling_head_kernel(
    node_ref,    # (TILE_N, H) bf16 : node-feature tile for this grid step
    batch_ref,   # (1, TILE_N) i32  : graph id per node (pad rows carry id == B)
    gattr_ref,   # (B, G) f32       : graph_attrs (resident)
    w1_ref,      # (2, H, H) bf16   : headMLP1 weights (layer 0, layer 1), resident
    b1_ref,      # (2, 1, H) f32    : headMLP1 biases, resident
    w2h_ref,     # (H, H) f32       : headMLP2 layer-1 weight, pooled-node part
    w2g_ref,     # (G, H) f32       : headMLP2 layer-1 weight, graph-attr part
    b2_ref,      # (1, H) f32
    w3_ref,      # (H, T_PAD) f32   : headMLP2 layer-2 weight (lane-padded)
    b3_ref,      # (1, T_PAD) f32
    out_ref,     # (B, T_PAD) f32
    pooled_acc,  # (B, H) f32 VMEM scratch : running per-graph sum
    count_acc,   # (B, 1) f32 VMEM scratch : running per-graph node count
):
    step = pl.program_id(0)

    @pl.when(step == 0)
    def _init():
        pooled_acc[...] = jnp.zeros_like(pooled_acc)
        count_acc[...] = jnp.zeros_like(count_acc)

    # headMLP1 on this node tile: Linear -> SiLU -> Linear (bf16 MXU, f32 accum)
    x = node_ref[...]                                                   # bf16
    h = jnp.dot(x, w1_ref[0], preferred_element_type=jnp.float32) + b1_ref[0]
    h = jax.nn.silu(h)
    h = (jnp.dot(h.astype(jnp.bfloat16), w1_ref[1],
                 preferred_element_type=jnp.float32) + b1_ref[1])

    # scatter-sum accumulation via one-hot (B, TILE_N) matmul.
    # Padded nodes carry graph id == B (out of range) so their one-hot column
    # is all zeros -> dropped, matching segment_sum semantics.
    batch = batch_ref[...]                                              # (1, TILE_N)
    B = pooled_acc.shape[0]
    tile_n = batch.shape[1]
    graph_ids = jax.lax.broadcasted_iota(jnp.int32, (B, tile_n), 0)     # (B, TILE_N)
    onehot = (graph_ids == batch).astype(jnp.float32)                   # 0/1 exact
    pooled_acc[...] += jnp.dot(onehot.astype(jnp.bfloat16),
                               h.astype(jnp.bfloat16),
                               preferred_element_type=jnp.float32)      # (B, H)
    count_acc[...] += jnp.sum(onehot, axis=-1, keepdims=True)           # (B, 1)

    # Finalize on the last node tile: mean divide + headMLP2 + lane-dense store.
    @pl.when(step == pl.num_programs(0) - 1)
    def _finalize():
        inv = pl.reciprocal(jnp.maximum(count_acc[...], 1.0), approx=True)
        pooled = pooled_acc[...] * inv                                  # mean pool
        z = (jnp.dot(pooled, w2h_ref[...], preferred_element_type=jnp.float32)
             + jnp.dot(gattr_ref[...], w2g_ref[...],
                       preferred_element_type=jnp.float32)
             + b2_ref[...])
        z = jax.nn.silu(z)
        out_ref[...] = (jnp.dot(z, w3_ref[...], preferred_element_type=jnp.float32)
                        + b3_ref[...])


def pooling_head_pallas(node_feats, batch, graph_attrs, params, num_graphs, num_tasks):
    N, H = node_feats.shape
    B = num_graphs
    G = graph_attrs.shape[1]
    T = num_tasks
    T_pad = _round_up(T, LANE)

    # Node-dimension tiling: TILE_N is a multiple of 128 (lane constraint on the
    # batch-id tile + MXU M-dim), capped at TILE_N_MAX.
    tile_n = min(TILE_N_MAX, _round_up(N, LANE))
    n_pad = _round_up(N, tile_n)
    n_steps = n_pad // tile_n

    # Pad nodes with zeros and an out-of-range graph id so pads are dropped.
    node_p = jnp.zeros((n_pad, H), jnp.bfloat16).at[:N].set(
        node_feats.astype(jnp.bfloat16))
    batch_p = jnp.full((1, n_pad), B, jnp.int32).at[0, :N].set(
        batch.astype(jnp.int32))

    # headMLP1 params packed into single resident buffers (bf16 weights).
    w1 = jnp.stack([params["w1a"], params["w1b"]]).astype(jnp.bfloat16)  # (2,H,H)
    b1 = jnp.stack([params["b1a"], params["b1b"]]).astype(jnp.float32)   # (2,1,H)

    # Lane-pad the final projection so the output store is lane-dense.
    w3p = jnp.zeros((H, T_pad), jnp.float32).at[:, :T].set(params["w3"])
    b3p = jnp.zeros((1, T_pad), jnp.float32).at[:, :T].set(params["b3"])

    args = (
        node_p, batch_p, graph_attrs.astype(jnp.float32),
        w1, b1,
        params["w2h"], params["w2g"], params["b2"],
        w3p, b3p,
    )

    def resident(shape):
        # Constant index_map: block DMA'd once, stays in VMEM across all steps.
        nd = len(shape)
        return pl.BlockSpec(shape, lambda i, nd=nd: (0,) * nd)

    in_specs = [
        pl.BlockSpec((tile_n, H), lambda i: (i, 0)),   # node tile (pipelined)
        pl.BlockSpec((1, tile_n), lambda i: (0, i)),   # batch-id tile (pipelined)
        resident((B, G)),
        resident((2, H, H)), resident((2, 1, H)),
        resident((H, H)), resident((G, H)), resident((1, H)),
        resident((H, T_pad)), resident((1, T_pad)),
    ]
    out_spec = resident((B, T_pad))

    out = pl.pallas_call(
        pooling_head_kernel,
        out_shape=jax.ShapeDtypeStruct((B, T_pad), jnp.float32),
        grid=(n_steps,),
        in_specs=in_specs,
        out_specs=out_spec,
        scratch_shapes=[pltpu.VMEM((B, H), jnp.float32),
                        pltpu.VMEM((B, 1), jnp.float32)],
        compiler_params=pltpu.CompilerParams(
            dimension_semantics=("arbitrary",),        # node axis is a reduction
            vmem_limit_bytes=32 * 1024 * 1024),
    )(*args)

    return out[:, :T]


def reference_forward(node_feats, batch, graph_attrs, params, num_graphs):
    # Pure-JAX (f32) reference of the same forward pass.
    h = jax.nn.silu(node_feats @ params["w1a"] + params["b1a"])
    h = h @ params["w1b"] + params["b1b"]
    summed = jax.ops.segment_sum(h, batch, num_segments=num_graphs)
    counts = jax.ops.segment_sum(jnp.ones((node_feats.shape[0], 1)), batch,
                                 num_segments=num_graphs)
    pooled = summed / jnp.maximum(counts, 1.0)
    z = jax.nn.silu(pooled @ params["w2h"] + graph_attrs @ params["w2g"]
                    + params["b2"])
    return z @ params["w3"] + params["b3"]


if __name__ == "__main__":
    # Small shapes consistent with the module.
    N = 16          # number of nodes
    H = 32          # c_hidden
    B = 2           # num_graphs (batch size)
    G = 4           # num_graph_feats
    T = 1           # num_tasks

    key = jax.random.PRNGKey(0)
    keys = jax.random.split(key, 12)

    node_feats = jax.random.normal(keys[0], (N, H), dtype=jnp.float32)
    graph_attrs = jax.random.normal(keys[1], (B, G), dtype=jnp.float32)
    # non-uniform graph assignment: 7 nodes in graph 0, 9 nodes in graph 1
    batch = jnp.array([0] * 7 + [1] * 9, dtype=jnp.int32)

    scale = 0.1
    params = {
        # headMLP1: Linear(H,H) -> SiLU -> Linear(H,H)
        "w1a": scale * jax.random.normal(keys[2], (H, H), dtype=jnp.float32),
        "b1a": scale * jax.random.normal(keys[3], (1, H), dtype=jnp.float32),
        "w1b": scale * jax.random.normal(keys[4], (H, H), dtype=jnp.float32),
        "b1b": scale * jax.random.normal(keys[5], (1, H), dtype=jnp.float32),
        # headMLP2 layer 1: Linear(H + G, H) split into (H,H) + (G,H)
        "w2h": scale * jax.random.normal(keys[6], (H, H), dtype=jnp.float32),
        "w2g": scale * jax.random.normal(keys[7], (G, H), dtype=jnp.float32),
        "b2":  scale * jax.random.normal(keys[8], (1, H), dtype=jnp.float32),
        # headMLP2 layer 2: Linear(H, T)
        "w3":  scale * jax.random.normal(keys[9], (H, T), dtype=jnp.float32),
        "b3":  scale * jax.random.normal(keys[10], (1, T), dtype=jnp.float32),
    }

    out = pooling_head_pallas(node_feats, batch, graph_attrs, params,
                              num_graphs=B, num_tasks=T)
    out = jax.block_until_ready(out)

    ref = reference_forward(node_feats, batch, graph_attrs, params, num_graphs=B)
    # bf16 MXU path + approx reciprocal -> compare against the f32 reference
    # with tolerances comfortably above the expected ~1e-3 error.
    np.testing.assert_allclose(np.asarray(out), np.asarray(ref),
                               rtol=2e-2, atol=1e-2)

    print("KERNEL_OK")
</pallas_src>

<mosaic_0001>
module attributes {stable_mosaic.version = 11 : i64} {
  func.func @pooling_head_kernel(%arg0: i32, %arg1: memref<128x32xbf16, #tpu.memory_space<vmem>>, %arg2: memref<1x128xi32, #tpu.memory_space<vmem>>, %arg3: memref<2x4xf32, #tpu.memory_space<vmem>>, %arg4: memref<2x32x32xbf16, #tpu.memory_space<vmem>>, %arg5: memref<2x1x32xf32, #tpu.memory_space<vmem>>, %arg6: memref<32x32xf32, #tpu.memory_space<vmem>>, %arg7: memref<4x32xf32, #tpu.memory_space<vmem>>, %arg8: memref<1x32xf32, #tpu.memory_space<vmem>>, %arg9: memref<32x128xf32, #tpu.memory_space<vmem>>, %arg10: memref<1x128xf32, #tpu.memory_space<vmem>>, %arg11: memref<2x128xf32, #tpu.memory_space<vmem>>, %arg12: memref<2x32xf32, #tpu.memory_space<vmem>>, %arg13: memref<2x1xf32, #tpu.memory_space<vmem>>) attributes {dimension_semantics = [#tpu.dimension_semantics<arbitrary>], iteration_bounds = array<i64: 1>, scalar_prefetch = 0 : i64, scratch_operands = 2 : i64, tpu.core_type = #tpu.core_type<tc>, window_params = [{transform_indices = @transform_0, window_bounds = array<i64: 128, 32>}, {transform_indices = @transform_1, window_bounds = array<i64: 1, 128>}, {pipeline_mode = #tpu.pipeline_mode<synchronous>, transform_indices = @transform_2, window_bounds = array<i64: 2, 4>}, {pipeline_mode = #tpu.pipeline_mode<synchronous>, transform_indices = @transform_3, window_bounds = array<i64: 2, 32, 32>}, {pipeline_mode = #tpu.pipeline_mode<synchronous>, transform_indices = @transform_4, window_bounds = array<i64: 2, 1, 32>}, {pipeline_mode = #tpu.pipeline_mode<synchronous>, transform_indices = @transform_5, window_bounds = array<i64: 32, 32>}, {pipeline_mode = #tpu.pipeline_mode<synchronous>, transform_indices = @transform_6, window_bounds = array<i64: 4, 32>}, {pipeline_mode = #tpu.pipeline_mode<synchronous>, transform_indices = @transform_7, window_bounds = array<i64: 1, 32>}, {pipeline_mode = #tpu.pipeline_mode<synchronous>, transform_indices = @transform_8, window_bounds = array<i64: 32, 128>}, {pipeline_mode = #tpu.pipeline_mode<synchronous>, transform_indices = @transform_9, window_bounds = array<i64: 1, 128>}, {pipeline_mode = #tpu.pipeline_mode<synchronous>, transform_indices = @transform_10, window_bounds = array<i64: 2, 128>}]} {
    %c0_i32 = arith.constant 0 : i32
    %0 = arith.cmpi eq, %arg0, %c0_i32 : i32
    %1 = arith.extui %0 : i1 to i32
    %c0_i32_0 = arith.constant 0 : i32
    %2 = arith.cmpi ne, %1, %c0_i32_0 : i32
    scf.if %2 {
      %cst_29 = arith.constant 0.000000e+00 : f32
      %45 = vector.broadcast %cst_29 : f32 to vector<2x32xf32>
      %c0_30 = arith.constant 0 : index
      %c0_31 = arith.constant 0 : index
      %46 = vector.load %arg12[%c0_30, %c0_31] : memref<2x32xf32, #tpu.memory_space<vmem>>, vector<2x32xf32>
      tpu.vector_store %arg12[%c0_30, %c0_31], %45 {strides = array<i32>} : memref<2x32xf32, #tpu.memory_space<vmem>>, vector<2x32xf32>,
      %cst_32 = arith.constant 0.000000e+00 : f32
      %47 = vector.broadcast %cst_32 : f32 to vector<2x1xf32>
      %c0_33 = arith.constant 0 : index
      %c0_34 = arith.constant 0 : index
      %48 = vector.load %arg13[%c0_33, %c0_34] : memref<2x1xf32, #tpu.memory_space<vmem>>, vector<2x1xf32>
      tpu.vector_store %arg13[%c0_33, %c0_34], %47 {strides = array<i32>} : memref<2x1xf32, #tpu.memory_space<vmem>>, vector<2x1xf32>,
    } else {
    }
    %c0 = arith.constant 0 : index
    %c0_1 = arith.constant 0 : index
    %3 = vector.load %arg1[%c0, %c0_1] : memref<128x32xbf16, #tpu.memory_space<vmem>>, vector<128x32xbf16>
    %c0_2 = arith.constant 0 : index
    %c0_3 = arith.constant 0 : index
    %c0_4 = arith.constant 0 : index
    %4 = vector.load %arg4[%c0_2, %c0_3, %c0_4] : memref<2x32x32xbf16, #tpu.memory_space<vmem>>, vector<1x32x32xbf16>
    %5 = vector.shape_cast %4 : vector<1x32x32xbf16> to vector<32x32xbf16>
    %cst = arith.constant dense<0.000000e+00> : vector<128x32xf32>
    %6 = tpu.matmul %3, %5, %cst {dimension_numbers = #tpu.dot_dimension_numbers<[1], [0], [0], [1], [0, 0, 1, 1], [], []>} : vector<128x32xbf16>, vector<32x32xbf16>, vector<128x32xf32> -> vector<128x32xf32>
    %c0_5 = arith.constant 0 : index
    %c0_6 = arith.constant 0 : index
    %c0_7 = arith.constant 0 : index
    %7 = vector.load %arg5[%c0_5, %c0_6, %c0_7] : memref<2x1x32xf32, #tpu.memory_space<vmem>>, vector<1x1x32xf32>
    %8 = vector.shape_cast %7 : vector<1x1x32xf32> to vector<1x32xf32>
    %9 = vector.broadcast %8 : vector<1x32xf32> to vector<128x32xf32>
    %10 = arith.addf %6, %9 : vector<128x32xf32>
    %11 = arith.negf %10 : vector<128x32xf32>
    %12 = math.exp %11 : vector<128x32xf32>
    %cst_8 = arith.constant 1.000000e+00 : f32
    %13 = vector.broadcast %cst_8 : f32 to vector<128x32xf32>
    %14 = arith.addf %13, %12 : vector<128x32xf32>
    %15 = arith.divf %13, %14 : vector<128x32xf32>
    %16 = arith.mulf %10, %15 : vector<128x32xf32>
    %17 = arith.truncf %16 : vector<128x32xf32> to vector<128x32xbf16>
    %c1 = arith.constant 1 : index
    %c0_9 = arith.constant 0 : index
    %c0_10 = arith.constant 0 : index
    %18 = vector.load %arg4[%c1, %c0_9, %c0_10] : memref<2x32x32xbf16, #tpu.memory_space<vmem>>, vector<1x32x32xbf16>
    %19 = vector.shape_cast %18 : vector<1x32x32xbf16> to vector<32x32xbf16>
    %cst_11 = arith.constant dense<0.000000e+00> : vector<128x32xf32>
    %20 = tpu.matmul %17, %19, %cst_11 {dimension_numbers = #tpu.dot_dimension_numbers<[1], [0], [0], [1], [0, 0, 1, 1], [], []>} : vector<128x32xbf16>, vector<32x32xbf16>, vector<128x32xf32> -> vector<128x32xf32>
    %c1_12 = arith.constant 1 : index
    %c0_13 = arith.constant 0 : index
    %c0_14 = arith.constant 0 : index
    %21 = vector.load %arg5[%c1_12, %c0_13, %c0_14] : memref<2x1x32xf32, #tpu.memory_space<vmem>>, vector<1x1x32xf32>
    %22 = vector.shape_cast %21 : vector<1x1x32xf32> to vector<1x32xf32>
    %23 = vector.broadcast %22 : vector<1x32xf32> to vector<128x32xf32>
    %24 = arith.addf %20, %23 : vector<128x32xf32>
    %c0_15 = arith.constant 0 : index
    %c0_16 = arith.constant 0 : index
    %25 = vector.load %arg2[%c0_15, %c0_16] : memref<1x128xi32, #tpu.memory_space<vmem>>, vector<1x128xi32>
    %26 = tpu.iota {dimensions = array<i32: 0>} : vector<2x128xi32>
    %27 = vector.broadcast %25 : vector<1x128xi32> to vector<2x128xi32>
    %28 = arith.cmpi eq, %26, %27 : vector<2x128xi32>
    %29 = arith.extui %28 : vector<2x128xi1> to vector<2x128xi32>
    %30 = arith.sitofp %29 : vector<2x128xi32> to vector<2x128xf32>
    %c0_17 = arith.constant 0 : index
    %c0_18 = arith.constant 0 : index
    %31 = vector.load %arg12[%c0_17, %c0_18] : memref<2x32xf32, #tpu.memory_space<vmem>>, vector<2x32xf32>
    %32 = arith.truncf %30 : vector<2x128xf32> to vector<2x128xbf16>
    %33 = arith.truncf %24 : vector<128x32xf32> to vector<128x32xbf16>
    %cst_19 = arith.constant dense<0.000000e+00> : vector<2x32xf32>
    %34 = tpu.matmul %32, %33, %cst_19 {dimension_numbers = #tpu.dot_dimension_numbers<[1], [0], [0], [1], [0, 0, 1, 1], [], []>} : vector<2x128xbf16>, vector<128x32xbf16>, vector<2x32xf32> -> vector<2x32xf32>
    %35 = arith.addf %31, %34 : vector<2x32xf32>
    %c0_20 = arith.constant 0 : index
    %c0_21 = arith.constant 0 : index
    %36 = vector.load %arg12[%c0_20, %c0_21] : memref<2x32xf32, #tpu.memory_space<vmem>>, vector<2x32xf32>
    tpu.vector_store %arg12[%c0_20, %c0_21], %35 {strides = array<i32>} : memref<2x32xf32, #tpu.memory_space<vmem>>, vector<2x32xf32>,
    %c0_22 = arith.constant 0 : index
    %c0_23 = arith.constant 0 : index
    %37 = vector.load %arg13[%c0_22, %c0_23] : memref<2x1xf32, #tpu.memory_space<vmem>>, vector<2x1xf32>
    %cst_24 = arith.constant dense<0.000000e+00> : vector<2xf32>
    %38 = vector.multi_reduction <add>, %30, %cst_24 [1] : vector<2x128xf32> to vector<2xf32>
    %39 = vector.shape_cast %38 : vector<2xf32> to vector<2x1xf32>
    %40 = arith.addf %37, %39 : vector<2x1xf32>
    %c0_25 = arith.constant 0 : index
    %c0_26 = arith.constant 0 : index
    %41 = vector.load %arg13[%c0_25, %c0_26] : memref<2x1xf32, #tpu.memory_space<vmem>>, vector<2x1xf32>
    tpu.vector_store %arg13[%c0_25, %c0_26], %40 {strides = array<i32>} : memref<2x1xf32, #tpu.memory_space<vmem>>, vector<2x1xf32>,
    %c0_i32_27 = arith.constant 0 : i32
    %42 = arith.cmpi eq, %arg0, %c0_i32_27 : i32
    %43 = arith.extui %42 : i1 to i32
    %c0_i32_28 = arith.constant 0 : i32
    %44 = arith.cmpi ne, %43, %c0_i32_28 : i32
    scf.if %44 {
      %c0_29 = arith.constant 0 : index
      %c0_30 = arith.constant 0 : index
      %45 = vector.load %arg13[%c0_29, %c0_30] : memref<2x1xf32, #tpu.memory_space<vmem>>, vector<2x1xf32>
      %cst_31 = arith.constant 1.000000e+00 : f32
      %46 = vector.broadcast %cst_31 : f32 to vector<2x1xf32>
      %47 = arith.maximumf %45, %46 : vector<2x1xf32>
      %48 = tpu.reciprocal %47 {approx = true} : vector<2x1xf32> -> vector<2x1xf32>
      %c0_32 = arith.constant 0 : index
      %c0_33 = arith.constant 0 : index
      %49 = vector.load %arg12[%c0_32, %c0_33] : memref<2x32xf32, #tpu.memory_space<vmem>>, vector<2x32xf32>
      %50 = vector.broadcast %48 : vector<2x1xf32> to vector<2x32xf32>
      %51 = arith.mulf %49, %50 : vector<2x32xf32>
      %c0_34 = arith.constant 0 : index
      %c0_35 = arith.constant 0 : index
      %52 = vector.load %arg6[%c0_34, %c0_35] : memref<32x32xf32, #tpu.memory_space<vmem>>, vector<32x32xf32>
      %cst_36 = arith.constant dense<0.000000e+00> : vector<2x32xf32>
      %53 = tpu.matmul %51, %52, %cst_36 {dimension_numbers = #tpu.dot_dimension_numbers<[1], [0], [0], [1], [0, 0, 1, 1], [], []>} : vector<2x32xf32>, vector<32x32xf32>, vector<2x32xf32> -> vector<2x32xf32>
      %c0_37 = arith.constant 0 : index
      %c0_38 = arith.constant 0 : index
      %54 = vector.load %arg3[%c0_37, %c0_38] : memref<2x4xf32, #tpu.memory_space<vmem>>, vector<2x4xf32>
      %c0_39 = arith.constant 0 : index
      %c0_40 = arith.constant 0 : index
      %55 = vector.load %arg7[%c0_39, %c0_40] : memref<4x32xf32, #tpu.memory_space<vmem>>, vector<4x32xf32>
      %cst_41 = arith.constant dense<0.000000e+00> : vector<2x32xf32>
      %56 = tpu.matmul %54, %55, %cst_41 {dimension_numbers = #tpu.dot_dimension_numbers<[1], [0], [0], [1], [0, 0, 1, 1], [], []>} : vector<2x4xf32>, vector<4x32xf32>, vector<2x32xf32> -> vector<2x32xf32>
      %57 = arith.addf %53, %56 : vector<2x32xf32>
      %c0_42 = arith.constant 0 : index
      %c0_43 = arith.constant 0 : index
      %58 = vector.load %arg8[%c0_42, %c0_43] : memref<1x32xf32, #tpu.memory_space<vmem>>, vector<1x32xf32>
      %59 = vector.broadcast %58 : vector<1x32xf32> to vector<2x32xf32>
      %60 = arith.addf %57, %59 : vector<2x32xf32>
      %61 = arith.negf %60 : vector<2x32xf32>
      %62 = math.exp %61 : vector<2x32xf32>
      %cst_44 = arith.constant 1.000000e+00 : f32
      %63 = vector.broadcast %cst_44 : f32 to vector<2x32xf32>
      %64 = arith.addf %63, %62 : vector<2x32xf32>
      %65 = arith.divf %63, %64 : vector<2x32xf32>
      %66 = arith.mulf %60, %65 : vector<2x32xf32>
      %c0_45 = arith.constant 0 : index
      %c0_46 = arith.constant 0 : index
      %67 = vector.load %arg9[%c0_45, %c0_46] : memref<32x128xf32, #tpu.memory_space<vmem>>, vector<32x128xf32>
      %cst_47 = arith.constant dense<0.000000e+00> : vector<2x128xf32>
      %68 = tpu.matmul %66, %67, %cst_47 {dimension_numbers = #tpu.dot_dimension_numbers<[1], [0], [0], [1], [0, 0, 1, 1], [], []>} : vector<2x32xf32>, vector<32x128xf32>, vector<2x128xf32> -> vector<2x128xf32>
      %c0_48 = arith.constant 0 : index
      %c0_49 = arith.constant 0 : index
      %69 = vector.load %arg10[%c0_48, %c0_49] : memref<1x128xf32, #tpu.memory_space<vmem>>, vector<1x128xf32>
      %70 = vector.broadcast %69 : vector<1x128xf32> to vector<2x128xf32>
      %71 = arith.addf %68, %70 : vector<2x128xf32>
      %c0_50 = arith.constant 0 : index
      %c0_51 = arith.constant 0 : index
      %72 = vector.load %arg11[%c0_50, %c0_51] : memref<2x128xf32, #tpu.memory_space<vmem>>, vector<2x128xf32>
      tpu.vector_store %arg11[%c0_50, %c0_51], %71 {strides = array<i32>} : memref<2x128xf32, #tpu.memory_space<vmem>>, vector<2x128xf32>,
    } else {
    }
    return
  }
  func.func @transform_0(%arg0: i32) -> (i32, i32) {
    %c0_i32 = arith.constant 0 : i32
    %c0_i32_0 = arith.constant 0 : i32
    return %arg0, %c0_i32 : i32, i32
  }
  func.func @transform_1(%arg0: i32) -> (i32, i32) {
    %c0_i32 = arith.constant 0 : i32
    %c0_i32_0 = arith.constant 0 : i32
    return %c0_i32, %arg0 : i32, i32
  }
  func.func @transform_2(%arg0: i32) -> (i32, i32) {
    %c0_i32 = arith.constant 0 : i32
    %c0_i32_0 = arith.constant 0 : i32
    %c0_i32_1 = arith.constant 0 : i32
    return %c0_i32, %c0_i32_0 : i32, i32
  }
  func.func @transform_3(%arg0: i32) -> (i32, i32, i32) {
    %c0_i32 = arith.constant 0 : i32
    %c0_i32_0 = arith.constant 0 : i32
    %c0_i32_1 = arith.constant 0 : i32
    %c0_i32_2 = arith.constant 0 : i32
    return %c0_i32, %c0_i32_0, %c0_i32_1 : i32, i32, i32
  }
  func.func @transform_4(%arg0: i32) -> (i32, i32, i32) {
    %c0_i32 = arith.constant 0 : i32
    %c0_i32_0 = arith.constant 0 : i32
    %c0_i32_1 = arith.constant 0 : i32
    %c0_i32_2 = arith.constant 0 : i32
    return %c0_i32, %c0_i32_0, %c0_i32_1 : i32, i32, i32
  }
  func.func @transform_5(%arg0: i32) -> (i32, i32) {
    %c0_i32 = arith.constant 0 : i32
    %c0_i32_0 = arith.constant 0 : i32
    %c0_i32_1 = arith.constant 0 : i32
    return %c0_i32, %c0_i32_0 : i32, i32
  }
  func.func @transform_6(%arg0: i32) -> (i32, i32) {
    %c0_i32 = arith.constant 0 : i32
    %c0_i32_0 = arith.constant 0 : i32
    %c0_i32_1 = arith.constant 0 : i32
    return %c0_i32, %c0_i32_0 : i32, i32
  }
  func.func @transform_7(%arg0: i32) -> (i32, i32) {
    %c0_i32 = arith.constant 0 : i32
    %c0_i32_0 = arith.constant 0 : i32
    %c0_i32_1 = arith.constant 0 : i32
    return %c0_i32, %c0_i32_0 : i32, i32
  }
  func.func @transform_8(%arg0: i32) -> (i32, i32) {
    %c0_i32 = arith.constant 0 : i32
    %c0_i32_0 = arith.constant 0 : i32
    %c0_i32_1 = arith.constant 0 : i32
    return %c0_i32, %c0_i32_0 : i32, i32
  }
  func.func @transform_9(%arg0: i32) -> (i32, i32) {
    %c0_i32 = arith.constant 0 : i32
    %c0_i32_0 = arith.constant 0 : i32
    %c0_i32_1 = arith.constant 0 : i32
    return %c0_i32, %c0_i32_0 : i32, i32
  }
  func.func @transform_10(%arg0: i32) -> (i32, i32) {
    %c0_i32 = arith.constant 0 : i32
    %c0_i32_0 = arith.constant 0 : i32
    %c0_i32_1 = arith.constant 0 : i32
    return %c0_i32, %c0_i32_0 : i32, i32
  }
}

</mosaic_0001>

<bundles_post_ra>
// kernel: tpu_custom_call.1
= control target key start
LH: loop header
LB: loop body
LE: loop exit
PB: predicated region body
PF: predicated region fallthrough
CT: control target
= control target key end

     0   :  { %15 = vsyncpa [#allocation5], 0  ;;  %s1576_s0 = inlined_call_operand.vmem [shape: bf16[128,32], index: 0, kind: input, shape index: {}]   ;;  %s1577_s1 = inlined_call_operand.hbm [shape: s32[1,128], index: 1, kind: input, shape index: {}]   ;;  %s1578_s2 = inlined_call_operand.vmem [shape: f32[2,4], index: 2, kind: input, shape index: {}]   ;;  %s1579_s3 = inlined_call_operand.vmem [shape: bf16[2,32,32], index: 3, kind: input, shape index: {}]   ;;  %s1580_s4 = inlined_call_operand.hbm [shape: f32[2,1,32], index: 4, kind: input, shape index: {}]   ;;  %s1581_s5 = inlined_call_operand.vmem [shape: f32[32,32], index: 5, kind: input, shape index: {}]   ;;  %s1582_s6 = inlined_call_operand.vmem [shape: f32[4,32], index: 6, kind: input, shape index: {}]   ;;  %s1583_s7 = inlined_call_operand.vmem [shape: f32[1,32], index: 7, kind: input, shape index: {}]   ;;  %s1584_s8 = inlined_call_operand.vmem [shape: f32[32,128], index: 8, kind: input, shape index: {}]   ;;  %s1585_s9 = inlined_call_operand.vmem [shape: f32[1,128], index: 9, kind: input, shape index: {}]   ;;  %s1586_s10 = inlined_call_operand.hbm [shape: f32[2,128], index: 10, kind: output, shape index: {}]  }
   0x1   :  { %16 = vsyncpa [#allocation8], 0 }
   0x2   :  { %17 = vsyncpa [#allocation6], 0  ;;  %s1261_s13 = smov [#allocation4]   ;;  %s1262_s15 = smov [#allocation7]  }
   0x3   :  { %s26_s14 = sshll.u32 %s1261_s13, 4  ;;  %s39_s16 = sshll.u32 %s1262_s15, 4  ;;  %s27_s14 = int_to_ptr.vmem [resolvable:$true] %s26_s14  ;;  %s1326_s16 = int_to_ptr.vmem [resolvable:$true] %s39_s16 }
   0x4   :  { %s1189_s19 = scalar_lea.hbm %s1577_s1, 16 }
   0x5   :  { %p1190_p0 = scmp.ne.s32.totalorder %s1577_s1, %s1189_s19  ;;  %p1193_p1 = scmp.lt.u32.totalorder %s1189_s19, %s1577_s1 }
   0x7   :  { %p1195_p2 = pnand %p1193_p1, %p1190_p0 }
   0x9   :  { %1198 = shalt.err (!%p1195_p2)
}
   0xa   :  { %s1199_s24 = scalar_lea.vmem %s27_s14, 16  ;;  %s1203_s25 = scalar_lea.vmem %s27_s14, 32 }
   0xb   :  { %p1200_p3 = scmp.ne.s32.totalorder %s27_s14, %s1199_s24  ;;  %p1204_p4 = scmp.lt.s32.totalorder %s27_s14, %s27_s14 }
   0xc   :  { %p1205_p5 = scmp.lt.s32.totalorder %s1203_s25, %s1199_s24 }
   0xe   :  { %p1206_p6 = por %p1205_p5, %p1204_p4 }
  0x10   :  { %p1207_p7 = pnand %p1206_p6, %p1200_p3 }
  0x12   :  { %1210 = shalt.err (!%p1207_p7)
}
  0x13   :  { %29 = dma.hbm_to_vmem [thread:$0]  %s1577_s1, 16, %s27_s14, [#allocation5]  }
  0x14   :  { %s1211_s30 = scalar_lea.hbm %s1580_s4, 32 }
  0x15   :  { %p1212_p8 = scmp.ne.s32.totalorder %s1580_s4, %s1211_s30  ;;  %p1215_p9 = scmp.lt.u32.totalorder %s1211_s30, %s1580_s4 }
  0x17   :  { %p1217_p10 = pnand %p1215_p9, %p1212_p8 }
  0x19   :  { %1220 = shalt.err (!%p1217_p10)
}
  0x1a   :  { %s1221_s17 = scalar_lea.vmem %s1326_s16, 32  ;;  %p1226_p12 = scmp.lt.s32.totalorder %s1326_s16, %s1326_s16 }
  0x1b   :  { %p1222_p11 = scmp.ne.s32.totalorder %s1326_s16, %s1221_s17  ;;  %p1227_p13 = scmp.lt.s32.totalorder %s1221_s17, %s1221_s17 }
  0x1d   :  { %p1228_p0 = por %p1227_p13, %p1226_p12 }
  0x1f   :  { %p1229_p1 = pnand %p1228_p0, %p1222_p11 }
  0x21   :  { %1232 = shalt.err (!%p1229_p1)
}
  0x22   :  { %s1263_s1 = smov 16   ;;  %s1264_s14 = smov 1  }
  0x23   :  { %45 = dma.hbm_to_vmem [thread:$0]  %s1580_s4, 32, %s1326_s16, [#allocation8], %s1263_s1, %s1263_s1, %s1264_s14  }
  0x24   :  { %1255 = dma.done.wait [#allocation5], 16  }
  0x25   :  { %1256 = vsyncadd [#allocation5], 4294967280 }
  0x26   :  { %1257 = dma.done.wait [#allocation8], 32  }
  0x27   :  { %1258 = vsyncadd [#allocation8], 4294967264  ;;  %v1107_v0 = vld [vmem:[%s1579_s3] sm:$0xff]   ;;  %v1108_v1 = vld [vmem:[%s1579_s3 + $0x8] sm:$0xff]   ;;  %vm150_vm0 = vcmask 261120   ;;  %v539_v12 = vlaneseq  ;;  %v1265_v14 = vmov 0.0  }
  0x28   :  { %997 = vmatprep.subr.bf16.mxu0 %v1107_v0  ;;  %v1109_v2 = vld [vmem:[%s1576_s0] sm:$0xff]   ;;  %v1110_v3 = vld [vmem:[%s1576_s0 + $0x8] sm:$0xff]   ;;  %v1111_v4 = vld [vmem:[%s1576_s0 + $0x10] sm:$0xff]   ;;  %vm602_vm1 = vcmask 1041408   ;;  %vm1266_vm3 = vmmov 0   ;;  %vm69_vm4 = vcmask 1024  }
  0x29   :  { %998 = vmatpush3.bf16.msra.mxu0 %v1107_v0  ;;  %1001 = vmatprep.mubr.msk.bf16.mxu0 %vm150_vm0, %v1109_v2  ;;  %v1112_v5 = vld [vmem:[%s1576_s0 + $0x18] sm:$0xff]   ;;  %v1113_v6 = vld [vmem:[%s1576_s0 + $0x20] sm:$0xff]   ;;  %v1114_v7 = vld [vmem:[%s1576_s0 + $0x28] sm:$0xff]   ;;  %v1405_v15 = vshrl.u32 %v539_v12, 7  ;;  %vm632_vm5 = vcmask 1043456   ;;  %vm67_vm6 = vcmask 254976  }
  0x2a   :  { %999 = vmatprep.subr.bf16.mxu0 %v1108_v1  ;;  %v1115_v8 = vld [vmem:[%s1576_s0 + $0x30] sm:$0xff]   ;;  %v1116_v9 = vld [vmem:[%s1576_s0 + $0x38] sm:$0xff]   ;;  %v1401_v13 = vld [vmem:[#allocation4] ss:$0 sm:$0xff]  ;;  %70 = vst.msk [vmem:[#allocation3] sm:$0x3] %vm69_vm4, %v1265_v14 }
  0x2b   :  { %v1117_v10 = vld [vmem:[%s1579_s3 + $0x10] sm:$0xff]   ;;  %v1118_v11 = vld [vmem:[%s1579_s3 + $0x18] sm:$0xff]   ;;  %vm545_vm2 = vcmp.eq.s32.totalorder %v1405_v15, %v1401_v13  ;;  %v1413_v18 = vld [vmem:[#allocation7] ss:$0 sm:$0xff]  ;;  %68 = vst.msk [vmem:[#allocation2] sm:$0x3] %vm67_vm6, %v1265_v14 }
  0x2c   :  { %1017 = vmatprep.subr.bf16.mxu1 %v1117_v10  ;;  %v946_v16 = vsel %vm545_vm2, 1.0, %v1265_v14  ;;  %vm947_vm7 = vmpackc.low %vm545_vm2, %vm545_vm2  ;;  %v624_v13 = vld [vmem:[%s1581_s5 + $0x10] sm:$0xff]  ;;  %v1269_v15 = vmov 0.0|0.0   ;;  %vm628_vm8 = vcmask 31744   ;;  %s1270_s18 = smov [#allocation9]  }
  0x2d   :  { %1000 = vmatpush3.bf16.msra.mxu0 %v1108_v1  ;;  %1018 = vmatpush3.bf16.msra.mxu1 %v1117_v10  ;;  %v603_v17 = vsel %vm602_vm1, %v946_v16, 0.0  ;;  %s885_s19 = sshll.u32 %s1270_s18, 4  ;;  %s886_s19 = int_to_ptr.vmem [resolvable:$true] %s885_s19 }
  0x2e   :  { %1019 = vmatprep.subr.bf16.mxu1 %v1118_v11  ;;  %1037 = vmatprep.subr.bf16.mxu0 %v1265_v14  ;;  %p1238_p3 = scmp.lt.s32.totalorder %s886_s19, %s886_s19 }
  0x2f   :  { %604 = vadd.xlane.f32.xlu0 %v603_v17 }
  0x30   :  { %1002 = vmatmul.mubr.msk.bf16.vlgmr.msra.gmra.mrb[0].mxu0 %vm150_vm0, %v1110_v3 }
  0x31   :  { %1005 = vmatprep.mubr.msk.bf16.mxu0 %vm150_vm0, %v1111_v4  ;;  %1020 = vmatpush3.bf16.msra.mxu1 %v1118_v11 }
  0x32   :  { %1057 = vmatprep.subr.mxu1 %v1265_v14 }
  0x38   :  { %1006 = vmatmul.mubr.msk.bf16.gmra.mrb[4].mxu0 %vm150_vm0, %v1112_v5 }
  0x39   :  { %1009 = vmatprep.mubr.msk.bf16.mxu0 %vm150_vm0, %v1113_v6 }
  0x40   :  { %1010 = vmatmul.mubr.msk.bf16.gmra.mrb[8].mxu0 %vm150_vm0, %v1114_v7 }
  0x41   :  { %1013 = vmatprep.mubr.msk.bf16.mxu0 %vm150_vm0, %v1115_v8 }
  0x48   :  { %1014 = vmatmul.mubr.msk.bf16.gmra.mrb[12].mxu0 %vm150_vm0, %v1116_v9 }
  0x49   :  { %1053 = vmatprep.mubr.msk.bf16.mxu0 %vm1266_vm3, %v1265_v14 }
 0x103   :  { %v1003_v19 = vpop.f32.mrb[0].mxu0 }
 0x104   :  { %v1416_v20 = vadd.f32 %v1003_v19, %v1413_v18  ;;  %v209_v21 = vpop.f32.mrb[1].mxu0 }
 0x105   :  { %v1419_v22 = vadd.f32 %v1413_v18, %v209_v21  ;;  %v1004_v23 = vpop.f32.mrb[2].mxu0 }
 0x106   :  { %v916_v24 = vmul.f32 -1.442695, %v1416_v20  ;;  %v1423_v25 = vadd.f32 %v1004_v23, %v1413_v18  ;;  %v212_v26 = vpop.f32.mrb[3].mxu0 }
 0x107   :  { %v914_v27 = vmul.f32 -1.442695, %v1419_v22  ;;  %v1427_v28 = vadd.f32 %v1413_v18, %v212_v26 }
 0x108   :  { %1119 = vpow2.f32 %v916_v24  ;;  %v917_v29 = vmul.f32 -1.442695, %v1423_v25 }
 0x109   :  { %1121 = vpow2.f32 %v914_v27  ;;  %v915_v30 = vmul.f32 -1.442695, %v1427_v28 }
 0x10a   :  { %1123 = vpow2.f32 %v917_v29 }
 0x10b   :  { %1125 = vpow2.f32 %v915_v30  ;;  %v1007_v31 = vpop.f32.mrb[4].mxu0 }
 0x10c   :  { %v1432_v32 = vadd.f32 %v1007_v31, %v1413_v18  ;;  %v225_v33 = vpop.f32.mrb[5].mxu0 }
 0x10d   :  { %v1435_v34 = vadd.f32 %v1413_v18, %v225_v33  ;;  %v1008_v35 = vpop.f32.mrb[6].mxu0 }
 0x10e   :  { %v920_v36 = vmul.f32 -1.442695, %v1432_v32  ;;  %v1439_v37 = vadd.f32 %v1008_v35, %v1413_v18  ;;  %v228_v38 = vpop.f32.mrb[7].mxu0 }
 0x10f   :  { %v918_v39 = vmul.f32 -1.442695, %v1435_v34  ;;  %v1443_v40 = vadd.f32 %v1413_v18, %v228_v38 }
 0x110   :  { %1127 = vpow2.f32 %v920_v36  ;;  %v921_v41 = vmul.f32 -1.442695, %v1439_v37 }
 0x111   :  { %1129 = vpow2.f32 %v918_v39  ;;  %v919_v42 = vmul.f32 -1.442695, %v1443_v40 }
 0x112   :  { %v1120_v43 = vpop.eup %1119  ;;  %1131 = vpow2.f32 %v921_v41 }
 0x113   :  { %v1122_v44 = vpop.eup %1121  ;;  %v322_v45 = vadd.f32 1.0, %v1120_v43  ;;  %1133 = vpow2.f32 %v919_v42  ;;  %v1011_v46 = vpop.f32.mrb[8].mxu0 }
 0x114   :  { %v1124_v47 = vpop.eup %1123  ;;  %v320_v48 = vadd.f32 1.0, %v1122_v44  ;;  %v1448_v49 = vadd.f32 %v1011_v46, %v1413_v18  ;;  %v241_v50 = vpop.f32.mrb[9].mxu0 }
 0x115   :  { %v1126_v51 = vpop.eup %1125  ;;  %1135 = vrcp.f32 %v322_v45  ;;  %v323_v52 = vadd.f32 1.0, %v1124_v47  ;;  %v1451_v53 = vadd.f32 %v1413_v18, %v241_v50  ;;  %v1012_v54 = vpop.f32.mrb[10].mxu0 }
 0x116   :  { %1137 = vrcp.f32 %v320_v48  ;;  %v321_v55 = vadd.f32 1.0, %v1126_v51  ;;  %v924_v56 = vmul.f32 -1.442695, %v1448_v49  ;;  %v1455_v57 = vadd.f32 %v1012_v54, %v1413_v18  ;;  %v244_v58 = vpop.f32.mrb[11].mxu0 }
 0x117   :  { %1139 = vrcp.f32 %v323_v52  ;;  %v922_v59 = vmul.f32 -1.442695, %v1451_v53  ;;  %v1459_v60 = vadd.f32 %v1413_v18, %v244_v58 }
 0x118   :  { %1141 = vrcp.f32 %v321_v55  ;;  %v925_v61 = vmul.f32 -1.442695, %v1455_v57 }
 0x119   :  { %1143 = vpow2.f32 %v924_v56  ;;  %v923_v62 = vmul.f32 -1.442695, %v1459_v60 }
 0x11a   :  { %v1128_v63 = vpop.eup %1127  ;;  %1145 = vpow2.f32 %v922_v59 }
 0x11b   :  { %v1130_v0 = vpop.eup %1129  ;;  %v326_v1 = vadd.f32 1.0, %v1128_v63  ;;  %1147 = vpow2.f32 %v925_v61  ;;  %v1015_v2 = vpop.f32.mrb[12].mxu0 }
 0x11c   :  { %v1132_v3 = vpop.eup %1131  ;;  %v324_v4 = vadd.f32 1.0, %v1130_v0  ;;  %1149 = vpow2.f32 %v923_v62  ;;  %v1464_v5 = vadd.f32 %v1015_v2, %v1413_v18  ;;  %v257_v6 = vpop.f32.mrb[13].mxu0 }
 0x11d   :  { %v1134_v7 = vpop.eup %1133  ;;  %1151 = vrcp.f32 %v326_v1  ;;  %v327_v8 = vadd.f32 1.0, %v1132_v3  ;;  %v1467_v9 = vadd.f32 %v1413_v18, %v257_v6  ;;  %v1016_v10 = vpop.f32.mrb[14].mxu0 }
 0x11e   :  { %1153 = vrcp.f32 %v324_v4  ;;  %v325_v11 = vadd.f32 1.0, %v1134_v7  ;;  %v928_v12 = vmul.f32 -1.442695, %v1464_v5  ;;  %v1471_v16 = vadd.f32 %v1016_v10, %v1413_v18  ;;  %v260_v17 = vpop.f32.mrb[15].mxu0 }
 0x11f   :  { %v1136_v19 = vpop.eup %1135  ;;  %1155 = vrcp.f32 %v327_v8  ;;  %v926_v21 = vmul.f32 -1.442695, %v1467_v9  ;;  %v1475_v23 = vadd.f32 %v1413_v18, %v260_v17 }
 0x120   :  { %v1138_v24 = vpop.eup %1137  ;;  %1157 = vrcp.f32 %v325_v11  ;;  %v929_v26 = vmul.f32 -1.442695, %v1471_v16  ;;  %v370_v31 = vmul.f32 %v1136_v19, %v1416_v20 }
 0x121   :  { %v1140_v27 = vpop.eup %1139  ;;  %1159 = vpow2.f32 %v928_v12  ;;  %v927_v29 = vmul.f32 -1.442695, %v1475_v23  ;;  %v368_v36 = vmul.f32 %v1138_v24, %v1419_v22 }
 0x122   :  { %v1142_v30 = vpop.eup %1141  ;;  %v371_v33 = vmul.f32 %v1140_v27, %v1423_v25  ;;  %1161 = vpow2.f32 %v926_v21 }
 0x123   :  { %v1144_v35 = vpop.eup %1143  ;;  %v369_v18 = vmul.f32 %v1142_v30, %v1427_v28  ;;  %1163 = vpow2.f32 %v929_v26 }
 0x124   :  { %v1146_v38 = vpop.eup %1145  ;;  %v385_v39 = vpack.c.bf16 %v371_v33, %v370_v31  ;;  %v330_v41 = vadd.f32 1.0, %v1144_v35  ;;  %1165 = vpow2.f32 %v927_v29  ;;  %v934_v31 = vld [vmem:[#allocation7 + $0x1] ss:$0 sm:$0xff] }
 0x125   :  { %v1148_v42 = vpop.eup %1147  ;;  %v328_v43 = vadd.f32 1.0, %v1146_v38  ;;  %v384_v44 = vpack.c.bf16 %v369_v18, %v368_v36 }
 0x126   :  { %v1150_v45 = vpop.eup %1149  ;;  %1167 = vrcp.f32 %v330_v41  ;;  %v331_v46 = vadd.f32 1.0, %v1148_v42 }
 0x127   :  { %v1152_v20 = vpop.eup %1151  ;;  %1169 = vrcp.f32 %v328_v43  ;;  %v329_v25 = vadd.f32 1.0, %v1150_v45  ;;  %1021 = vmatprep.mubr.msk.bf16.mxu1 %vm150_vm0, %v384_v44 }
 0x128   :  { %v1154_v47 = vpop.eup %1153  ;;  %1171 = vrcp.f32 %v331_v46  ;;  %1022 = vmatmul.mubr.msk.bf16.vlgmr.msra.gmra.mrb[0].mxu1 %vm150_vm0, %v385_v39  ;;  %v374_v48 = vmul.f32 %v1152_v20, %v1432_v32 }
 0x129   :  { %v1156_v22 = vpop.eup %1155  ;;  %1173 = vrcp.f32 %v329_v25  ;;  %v372_v52 = vmul.f32 %v1154_v47, %v1435_v34 }
 0x12a   :  { %v1158_v28 = vpop.eup %1157  ;;  %v375_v50 = vmul.f32 %v1156_v22, %v1439_v37 }
 0x12b   :  { %v1160_v51 = vpop.eup %1159  ;;  %v373_v54 = vmul.f32 %v1158_v28, %v1443_v40 }
 0x12c   :  { %v1162_v55 = vpop.eup %1161  ;;  %v387_v56 = vpack.c.bf16 %v375_v50, %v374_v48  ;;  %v334_v58 = vadd.f32 1.0, %v1160_v51 }
 0x12d   :  { %v1164_v59 = vpop.eup %1163  ;;  %v386_v61 = vpack.c.bf16 %v373_v54, %v372_v52  ;;  %v332_v62 = vadd.f32 1.0, %v1162_v55 }
 0x12e   :  { %v1166_v63 = vpop.eup %1165  ;;  %1175 = vrcp.f32 %v334_v58  ;;  %v335_v0 = vadd.f32 1.0, %v1164_v59 }
 0x12f   :  { %1177 = vrcp.f32 %v332_v62  ;;  %v333_v1 = vadd.f32 1.0, %v1166_v63  ;;  %1025 = vmatprep.mubr.msk.bf16.mxu1 %vm150_vm0, %v386_v61 }
 0x130   :  { %v1168_v32 = vpop.eup %1167  ;;  %1179 = vrcp.f32 %v335_v0  ;;  %1026 = vmatmul.mubr.msk.bf16.gmra.mrb[4].mxu1 %vm150_vm0, %v387_v56 }
 0x131   :  { %v1170_v34 = vpop.eup %1169  ;;  %1181 = vrcp.f32 %v333_v1  ;;  %v378_v2 = vmul.f32 %v1168_v32, %v1448_v49 }
 0x132   :  { %v1172_v37 = vpop.eup %1171  ;;  %v376_v4 = vmul.f32 %v1170_v34, %v1451_v53 }
 0x133   :  { %v1174_v40 = vpop.eup %1173  ;;  %v379_v3 = vmul.f32 %v1172_v37, %v1455_v57 }
 0x134   :  { %v377_v6 = vmul.f32 %v1174_v40, %v1459_v60 }
 0x135   :  { %v389_v7 = vpack.c.bf16 %v379_v3, %v378_v2 }
 0x136   :  { %v388_v8 = vpack.c.bf16 %v377_v6, %v376_v4 }
 0x138   :  { %v1176_v10 = vpop.eup %1175  ;;  %1029 = vmatprep.mubr.msk.bf16.mxu1 %vm150_vm0, %v388_v8  ;;  %v622_v8 = vld [vmem:[%s1581_s5] sm:$0xff] }
 0x139   :  { %v1178_v11 = vpop.eup %1177  ;;  %1030 = vmatmul.mubr.msk.bf16.gmra.mrb[8].mxu1 %vm150_vm0, %v389_v7  ;;  %v382_v19 = vmul.f32 %v1176_v10, %v1464_v5  ;;  %v627_v5 = vld [vmem:[%s1582_s6] sm:$0xf]  ;;  %v1268_v7 = vmov 1.0|1.0   ;;  %v623_v10 = vld [vmem:[%s1581_s5 + $0x8] sm:$0xff] }
 0x13a   :  { %v1180_v12 = vpop.eup %1179  ;;  %v380_v57 = vmul.f32 %v1178_v11, %v1467_v9  ;;  %v1267_v9 = vmov 0   ;;  %1058 = vmatpush3.msk.msra.mxu1 %vm632_vm5, %v627_v5  ;;  %v1085_v11 = vpack.c.bf16 %v623_v10, %v622_v8 }
 0x13b   :  { %v1182_v17 = vpop.eup %1181  ;;  %v383_v49 = vmul.f32 %v1180_v12, %v1471_v16  ;;  %1106 = vset.pattern.permute.xlu0 %v1267_v9  ;;  %v605_v16 = vpop.xlane.xlu0 %604  ;;  %v625_v12 = vld [vmem:[%s1581_s5 + $0x18] sm:$0xff]  ;;  %1090 = vmatprep.subr.bf16.mxu1 %v1269_v15 }
 0x13c   :  { %v381_v53 = vmul.f32 %v1182_v17, %v1475_v23  ;;  %v601_v23 = vld [vmem:[#allocation3] sm:$0x3]  ;;  %v1088_v17 = vpack.c.bf16 %v625_v12, %v624_v13 }
 0x13d   :  { %v391_v21 = vpack.c.bf16 %v383_v49, %v382_v19  ;;  %v606_v24 = vadd.f32 %v605_v16, %v601_v23  ;;  %v626_v19 = vld [vmem:[%s1578_s2] sm:$0x3] }
 0x13e   :  { %v390_v60 = vpack.c.bf16 %v381_v53, %v380_v57  ;;  %v548_v49 = vld [vmem:[#allocation2] sm:$0x3] }
 0x13f   :  { %608 = vst.msk [vmem:[#allocation3] sm:$0x3] %vm69_vm4, %v606_v24 }
 0x140   :  { %1033 = vmatprep.mubr.msk.bf16.mxu1 %vm150_vm0, %v390_v60 }
 0x141   :  { %1034 = vmatmul.mubr.msk.bf16.gmra.mrb[12].mxu1 %vm150_vm0, %v391_v21 }
 0x142   :  { %1059 = vmatprep.mubr.msk.f32.mxu1 %vm1266_vm3, %v1265_v14 }
 0x146   :  { %v612_v26 = vld [vmem:[#allocation3] sm:$0x3] }
 0x147   :  { %v613_v27 = vmax.f32 %v612_v26, 1.0 }
 0x149   :  { %1183 = vrcp.f32 %v613_v27  ;;  %1060 = vmatmul.mubr.msk.f32.vlgmr.msra.gmra.mrb[16].mxu1 %vm628_vm8, %v626_v19  ;;  %v794_v27 = vld [vmem:[%s1584_s8] sm:$0xff] }
 0x14a   :  { %1081 = vmatprep.mubr.msk.f32.mxu1 %vm1266_vm3, %v1265_v14 }
 0x153   :  { %v1184_v29 = vpop.eup %1183 }
 0x154   :  { %618 = vperm.xlu0 %1106, %v1184_v29  }
 0x1d3   :  { %v619_v9 = vpop.permute.xlu0 %618 }
 0x1fb   :  { %v1023_v30 = vpop.f32.mrb[0].mxu1 }
 0x1fc   :  { %v475_v33 = vpop.f32.mrb[1].mxu1  ;;  %v484_v36 = vadd.f32 %v1023_v30, %v934_v31  ;;  %v796_v30 = vld [vmem:[%s1584_s8 + $0x10] sm:$0xff] }
 0x1fd   :  { %v1024_v35 = vpop.f32.mrb[2].mxu1  ;;  %v476_v39 = vadd.f32 %v934_v31, %v475_v33 }
 0x1fe   :  { %v487_v18 = vadd.f32 %v1024_v35, %v934_v31  ;;  %v478_v38 = vpop.f32.mrb[3].mxu1 }
 0x1ff   :  { %v479_v41 = vadd.f32 %v934_v31, %v478_v38 }
 0x200   :  { %v551_v42 = vpack.c.bf16 %v487_v18, %v484_v36  ;;  %v952_v36 = vld [vmem:[%s1583_s7] ss:$0 sm:$0xff]  ;;  %s1233_s7 = scalar_lea.vmem %s886_s19, 32 }
 0x201   :  { %v550_v43 = vpack.c.bf16 %v479_v41, %v476_v39  ;;  %p1234_p2 = scmp.ne.s32.totalorder %s886_s19, %s1233_s7  ;;  %p1239_p4 = scmp.lt.s32.totalorder %s1233_s7, %s1233_s7 }
 0x203   :  { %v1027_v44 = vpop.f32.mrb[4].mxu1  ;;  %1038 = vmatpush3.bf16.msra.mxu0 %v550_v43  ;;  %p1240_p5 = por %p1239_p4, %p1238_p3 }
 0x204   :  { %v491_v45 = vpop.f32.mrb[5].mxu1  ;;  %1039 = vmatprep.subr.bf16.mxu0 %v1265_v14  ;;  %v500_v20 = vadd.f32 %v1027_v44, %v934_v31 }
 0x205   :  { %v1028_v46 = vpop.f32.mrb[6].mxu1  ;;  %v492_v22 = vadd.f32 %v934_v31, %v491_v45  ;;  %p1241_p6 = pnand %p1240_p5, %p1234_p2 }
 0x206   :  { %v503_v25 = vadd.f32 %v1028_v46, %v934_v31  ;;  %v494_v47 = vpop.f32.mrb[7].mxu1  ;;  %v954_v46 = vld [vmem:[%s1585_s9] ss:$0 sm:$0xff] }
 0x207   :  { %v495_v28 = vadd.f32 %v934_v31, %v494_v47  ;;  %1040 = vmatpush3.bf16.msra.mxu0 %v551_v42 }
 0x208   :  { %v553_v48 = vpack.c.bf16 %v503_v25, %v500_v20  ;;  %1041 = vmatprep.subr.bf16.mxu0 %v1265_v14 }
 0x209   :  { %v552_v50 = vpack.c.bf16 %v495_v28, %v492_v22 }
 0x20b   :  { %1042 = vmatpush3.bf16.msra.mxu0 %v552_v50 }
 0x20c   :  { %v1031_v51 = vpop.f32.mrb[8].mxu1  ;;  %1043 = vmatprep.subr.bf16.mxu0 %v1265_v14 }
 0x20d   :  { %v507_v52 = vpop.f32.mrb[9].mxu1  ;;  %v516_v55 = vadd.f32 %v1031_v51, %v934_v31 }
 0x20e   :  { %v1032_v54 = vpop.f32.mrb[10].mxu1  ;;  %v508_v59 = vadd.f32 %v934_v31, %v507_v52 }
 0x20f   :  { %v519_v56 = vadd.f32 %v1032_v54, %v934_v31  ;;  %v510_v58 = vpop.f32.mrb[11].mxu1  ;;  %1044 = vmatpush3.bf16.msra.mxu0 %v553_v48 }
 0x210   :  { %v511_v61 = vadd.f32 %v934_v31, %v510_v58  ;;  %1045 = vmatprep.subr.bf16.mxu0 %v1265_v14 }
 0x211   :  { %v555_v62 = vpack.c.bf16 %v519_v56, %v516_v55 }
 0x212   :  { %v554_v63 = vpack.c.bf16 %v511_v61, %v508_v59 }
 0x214   :  { %v1035_v0 = vpop.f32.mrb[12].mxu1  ;;  %1046 = vmatpush3.bf16.msra.mxu0 %v554_v63 }
 0x215   :  { %v523_v1 = vpop.f32.mrb[13].mxu1  ;;  %1047 = vmatprep.subr.bf16.mxu0 %v1265_v14  ;;  %v532_v34 = vadd.f32 %v1035_v0, %v934_v31 }
 0x216   :  { %v1036_v32 = vpop.f32.mrb[14].mxu1  ;;  %v524_v2 = vadd.f32 %v934_v31, %v523_v1 }
 0x217   :  { %v535_v37 = vadd.f32 %v1036_v32, %v934_v31  ;;  %v526_v40 = vpop.f32.mrb[15].mxu1 }
 0x218   :  { %v527_v3 = vadd.f32 %v934_v31, %v526_v40  ;;  %1048 = vmatpush3.bf16.msra.mxu0 %v555_v62  ;;  %v797_v31 = vld [vmem:[%s1584_s8 + $0x18] sm:$0xff] }
 0x219   :  { %v557_v4 = vpack.c.bf16 %v535_v37, %v532_v34  ;;  %1049 = vmatprep.subr.bf16.mxu0 %v1265_v14  ;;  %v1094_v33 = vpack.c.bf16 %v797_v31, %v796_v30 }
 0x21a   :  { %v556_v6 = vpack.c.bf16 %v527_v3, %v524_v2 }
 0x21c   :  { %1050 = vmatpush3.bf16.msra.mxu0 %v556_v6  ;;  %v702_v24 = vpop.f32.mrb[16].mxu1 }
 0x21d   :  { %1051 = vmatprep.subr.bf16.mxu0 %v1265_v14  ;;  %v1061_v26 = vpop.f32.mrb[17].mxu1 }
 0x220   :  { %1052 = vmatpush3.bf16.msra.mxu0 %v557_v4 }
 0x221   :  { %1084 = vmatprep.subr.bf16.mxu0 %v1269_v15 }
 0x223   :  { %1054 = vmatmul.mubr.msk.bf16.vlgmr.msra.gmra.mrb[16].mxu0 %vm947_vm7, %v1268_v7 }
 0x224   :  { %1070 = vmatprep.mubr.msk.f32.mxu0 %vm1266_vm3, %v1265_v14  ;;  %1086 = vmatpush3.bf16.msra.mxu0 %v1085_v11  ;;  %v795_v14 = vld [vmem:[%s1584_s8 + $0x8] sm:$0xff] }
 0x225   :  { %1087 = vmatprep.subr.bf16.mxu0 %v1269_v15  ;;  %v1091_v29 = vpack.c.bf16 %v795_v14, %v794_v27 }
 0x227   :  { %1092 = vmatpush3.bf16.msra.mxu1 %v1091_v29 }
 0x228   :  { %1089 = vmatpush3.bf16.msra.mxu0 %v1088_v17  ;;  %1093 = vmatprep.subr.bf16.mxu1 %v1269_v15 }
 0x22b   :  { %1095 = vmatpush3.bf16.msra.mxu1 %v1094_v33 }
 0x2f6   :  { %v592_v57 = vpop.f32.mrb[16].mxu0 }
 0x2f7   :  { %v598_v53 = vadd.f32 %v592_v57, %v548_v49  ;;  %v1055_v21 = vpop.f32.mrb[17].mxu0 }
 0x2f8   :  { %v595_v60 = vpop.f32.mrb[18].mxu0 }
 0x2f9   :  { %600 = vst.msk [vmem:[#allocation2] sm:$0x3] %vm67_vm6, %v598_v53  ;;  %v1056_v5 = vpop.f32.mrb[19].mxu0 }
 0x300   :  { %v615_v16 = vld [vmem:[#allocation2] sm:$0x3] }
 0x301   :  { %v621_v23 = vmul.f32 %v619_v9, %v615_v16 }
 0x303   :  { %1071 = vmatmul.mubr.msk.f32.vlgmr.msra.gmra.mrb[20].mxu0 %vm150_vm0, %v621_v23 }
 0x3d6   :  { %v775_v35 = vpop.f32.mrb[20].mxu0 }
 0x3d7   :  { %v776_v18 = vadd.f32 %v775_v35, %v702_v24  ;;  %v1072_v38 = vpop.f32.mrb[21].mxu0 }
 0x3d9   :  { %v786_v39 = vadd.f32 %v952_v36, %v776_v18 }
 0x3db   :  { %v953_v41 = vmul.f32 -1.442695, %v786_v39 }
 0x3dd   :  { %1185 = vpow2.f32 %v953_v41 }
 0x3e7   :  { %v1186_v42 = vpop.eup %1185 }
 0x3e8   :  { %v790_v43 = vadd.f32 1.0, %v1186_v42 }
 0x3ea   :  { %1187 = vrcp.f32 %v790_v43 }
 0x3f4   :  { %v1188_v44 = vpop.eup %1187 }
 0x3f5   :  { %v793_v45 = vmul.f32 %v1188_v44, %v786_v39 }
 0x3f7   :  { %1082 = vmatmul.mubr.msk.f32.vlgmr.msra.gmra.mrb[18].mxu1 %vm150_vm0, %v793_v45 }
 0x4ca   :  { %v874_v20 = vpop.f32.mrb[18].mxu1 }
 0x4cb   :  { %v875_v25 = vadd.f32 %v954_v46, %v874_v20  ;;  %v1083_v47 = vpop.f32.mrb[19].mxu1 }
 0x4cd   :  { %878 = vst [vmem:[#allocation9] sm:$0x3] %v875_v25 }
 0x4ce   :  { %1244 = shalt.err (!%p1241_p6)
}
 0x4cf   :  { %s1245_s0 = scalar_lea.hbm %s1586_s10, 32 }
 0x4d0   :  { %p1246_p7 = scmp.ne.s32.totalorder %s1586_s10, %s1245_s0  ;;  %p1249_p8 = scmp.lt.u32.totalorder %s1245_s0, %s1586_s10 }
 0x4d2   :  { %p1251_p9 = pnand %p1249_p8, %p1246_p7 }
 0x4d4   :  { %1254 = shalt.err (!%p1251_p9)
}
 0x4d5   :  { %888 = dma.vmem_to_hbm [thread:$0]  %s886_s19, 32, %s1586_s10, [#allocation6]  }
 0x4d6   :  { %1259 = dma.done.wait [#allocation6], 32  }
 0x4d7   :  { %1260 = vsyncadd [#allocation6], 4294967264 }
 0x4d8   :  { %892 = vsyncpa [#allocation5], 1 }
 0x4d9   :  { %893 = vsyncpa [#allocation8], 1 }
 0x4da   :  { %894 = vsyncpa [#allocation6], 1 }

</bundles_post_ra>
